<compile_context>
chip_gen: v7x
topology: tpu7x:2x2x1
jax: 0.10.0
libtpu: 0.0.40
codegen_flags: <defaults>
</compile_context>

<pallas_src>
import functools

import jax
import jax.numpy as jnp
from jax.experimental import pallas as pl
from jax.experimental.pallas import tpu as pltpu


def _ce_kernel(logits_ref, labels_ref, sum_ref, cnt_ref, acc_sum, acc_cnt,
               *, hw, ignore_label, mask_tail):
    j = pl.program_id(1)
    tile_n = logits_ref.shape[-1]

    @pl.when(j == 0)
    def _():
        acc_sum[...] = jnp.zeros_like(acc_sum)
        acc_cnt[...] = jnp.zeros_like(acc_cnt)

    logits = logits_ref[...].astype(jnp.float32)      # (C, tile_n) class-major
    labels = labels_ref[...]                          # (1, tile_n) int32

    # lane validity: ragged tail (only when hw % tile_n != 0, else compiled out)
    valid = None
    if mask_tail:
        lane = jax.lax.broadcasted_iota(jnp.int32, (1, tile_n), 1)
        in_range = (j * tile_n + lane) < hw           # (1, tile_n) bool
        # zero out-of-range lanes so garbage in a partial tail block cannot NaN
        logits = jnp.where(in_range, logits, 0.0)
        valid = in_range
    # ... plus optional ignore_label
    if ignore_label is not None:
        keep = labels != ignore_label
        valid = keep if valid is None else jnp.logical_and(valid, keep)

    # numerically-stable logsumexp over the class (sublane) axis
    m = jnp.max(logits, axis=0, keepdims=True)                            # (1, tile_n)
    lse = jnp.log(jnp.sum(jnp.exp(logits - m), axis=0, keepdims=True)) + m

    # gather logit[label] via one-hot compare (no per-lane dynamic gather on TPU)
    class_iota = jax.lax.broadcasted_iota(jnp.int32, logits.shape, 0)     # (C, tile_n)
    picked = jnp.sum(jnp.where(class_iota == labels, logits, 0.0),
                     axis=0, keepdims=True)                               # (1, tile_n)

    per_pixel = lse - picked                                              # (1, tile_n)

    # vreg-shaped accumulators: elementwise adds only (VPU); no per-step
    # cross-lane reduction and no serializing scalar dependence
    if valid is None:
        acc_sum[...] += per_pixel
        acc_cnt[...] += 1.0
    else:
        vf = valid.astype(jnp.float32)
        acc_sum[...] += per_pixel * vf
        acc_cnt[...] += vf

    @pl.when(j == pl.num_programs(1) - 1)
    def _():
        # single cross-lane reduction per batch row
        sum_ref[...] = jnp.sum(acc_sum[...], keepdims=True)
        cnt_ref[...] = jnp.sum(acc_cnt[...], keepdims=True)


def cross_entropy_2d(preds, masks, *, nclass, ignore_label=None, tile_n=None):
    """preds: [B, C, H, W] float; masks: [B, H, W] int -> scalar mean CE loss."""
    B, C, H, W = preds.shape
    assert C == nclass
    hw = H * W

    # class-major, lane-dense layout straight from NCHW: reshapes only, no
    # transpose and no padding pass over HBM.  Input dtype (e.g. bf16) is kept
    # all the way into the kernel; upcast to f32 happens on-chip.
    logits = preds.reshape(B, C, hw)
    labels = masks.reshape(B, 1, hw).astype(jnp.int32)

    if tile_n is None:
        # VMEM-footprint-aware tile sizing (makes per-step DMA >> the ~0.35us
        # fixed grid-step cost).  Sublane padding: a (C, N) 32-bit block is
        # physically (ceil(C/8)*8, N) in VMEM; every (1, N) row pads to (8, N).
        cp = pl.cdiv(C, 8) * 8
        bytes_per_lane = (2 * cp * 4      # logits block, double-buffered
                          + 2 * 8 * 4     # labels block, double-buffered
                          + 2 * 8 * 4     # (sum, cnt) accumulators
                          + 2 * cp * 4    # f32 upcast + exp temporaries
                          + 6 * 8 * 4)    # (1, N) row temporaries (m/lse/picked/...)
        tile_n = (20 * 1024 * 1024) // bytes_per_lane   # ~20 MiB working set
        tile_n = min(tile_n, 64 * 1024)

    # pixel-tile width: a multiple of 128 lanes (or the full pixel extent when
    # that is smaller / not 128-aligned); any ragged tail is masked in-kernel.
    tile_n = max(128, (int(tile_n) // 128) * 128)
    tile_n = min(tile_n, pl.cdiv(hw, 128) * 128)
    if tile_n > hw:
        tile_n = hw
    n_tiles = pl.cdiv(hw, tile_n)
    mask_tail = (hw % tile_n) != 0

    kernel = functools.partial(_ce_kernel, hw=hw, ignore_label=ignore_label,
                               mask_tail=mask_tail)

    n_pix = B * hw
    cost = pl.CostEstimate(
        flops=6 * n_pix * C,
        transcendentals=n_pix * (C + 1),
        bytes_accessed=n_pix * C * preds.dtype.itemsize + n_pix * 4 + 8 * B,
    )

    loss_sum, loss_cnt = pl.pallas_call(
        kernel,
        out_shape=(
            jax.ShapeDtypeStruct((B, 1, 1), jnp.float32),
            jax.ShapeDtypeStruct((B, 1, 1), jnp.float32),
        ),
        grid_spec=pltpu.PrefetchScalarGridSpec(
            num_scalar_prefetch=0,
            grid=(B, n_tiles),
            in_specs=[
                pl.BlockSpec((None, C, tile_n), lambda b, j: (b, 0, j)),
                pl.BlockSpec((None, 1, tile_n), lambda b, j: (b, 0, j)),
            ],
            out_specs=[
                pl.BlockSpec((None, 1, 1), lambda b, j: (b, 0, 0)),
                pl.BlockSpec((None, 1, 1), lambda b, j: (b, 0, 0)),
            ],
            scratch_shapes=[
                pltpu.VMEM((1, tile_n), jnp.float32),
                pltpu.VMEM((1, tile_n), jnp.float32),
            ],
        ),
        compiler_params=pltpu.CompilerParams(
            # batch axis writes independent output rows -> megacore / v7x dual-TC
            dimension_semantics=("parallel", "arbitrary"),
            # tiles are sized (above) to double-buffer comfortably under every
            # generation's scoped VMEM (incl. v7x's 64 MiB per-TC physical)
            vmem_limit_bytes=32 * 1024 * 1024,
        ),
        cost_estimate=cost,
    )(logits, labels)

    # per-batch-row partials -> global masked mean
    return jnp.sum(loss_sum) / jnp.sum(loss_cnt)


def _reference_ce(preds, masks, ignore_label=None):
    """Pure-JAX reference matching nn.CrossEntropyLoss mean semantics."""
    B, C, H, W = preds.shape
    logits = jnp.transpose(preds, (0, 2, 3, 1)).reshape(-1, C).astype(jnp.float32)
    labels = masks.reshape(-1).astype(jnp.int32)
    logp = jax.nn.log_softmax(logits, axis=-1)
    nll = -jnp.take_along_axis(logp, labels[:, None], axis=-1)[:, 0]
    if ignore_label is not None:
        valid = (labels != ignore_label).astype(jnp.float32)
        return jnp.sum(nll * valid) / jnp.sum(valid)
    return jnp.mean(nll)


if __name__ == "__main__":
    key = jax.random.PRNGKey(0)
    B, C, H, W = 2, 4, 16, 16
    k1, k2 = jax.random.split(key)
    preds = jax.random.normal(k1, (B, C, H, W), dtype=jnp.float32)
    masks = jax.random.randint(k2, (B, H, W), 0, C, dtype=jnp.int32)

    loss = cross_entropy_2d(preds, masks, nclass=C, ignore_label=None)
    loss = jax.block_until_ready(loss)
    ref = _reference_ce(preds, masks, ignore_label=None)
    assert jnp.allclose(loss, ref, atol=1e-5, rtol=1e-5), (loss, ref)

    # also exercise the ignore_label path (label 0 ignored)
    loss_ig = cross_entropy_2d(preds, masks, nclass=C, ignore_label=0)
    loss_ig = jax.block_until_ready(loss_ig)
    ref_ig = _reference_ce(preds, masks, ignore_label=0)
    assert jnp.allclose(loss_ig, ref_ig, atol=1e-5, rtol=1e-5), (loss_ig, ref_ig)

    # exercise a ragged / multi-tile pixel axis with a forced small tile
    k3, k4 = jax.random.split(k1)
    preds2 = jax.random.normal(k3, (1, C, 20, 20), dtype=jnp.float32)   # hw=400
    masks2 = jax.random.randint(k4, (1, 20, 20), 0, C, dtype=jnp.int32)
    loss2 = jax.block_until_ready(
        cross_entropy_2d(preds2, masks2, nclass=C, ignore_label=None, tile_n=128))
    ref2 = _reference_ce(preds2, masks2, ignore_label=None)
    assert jnp.allclose(loss2, ref2, atol=1e-5, rtol=1e-5), (loss2, ref2)

    print("KERNEL_OK")
</pallas_src>

<mosaic_0001>
module attributes {stable_mosaic.version = 11 : i64} {
  func.func @_ce_kernel(%arg0: i32, %arg1: i32, %arg2: memref<1x4x256xf32, #tpu.memory_space<vmem>>, %arg3: memref<1x1x256xi32, #tpu.memory_space<vmem>>, %arg4: memref<1x1x1xf32, #tpu.memory_space<vmem>>, %arg5: memref<1x1x1xf32, #tpu.memory_space<vmem>>, %arg6: memref<1x256xf32, #tpu.memory_space<vmem>>, %arg7: memref<1x256xf32, #tpu.memory_space<vmem>>) attributes {dimension_semantics = [#tpu.dimension_semantics<parallel>, #tpu.dimension_semantics<arbitrary>], iteration_bounds = array<i64: 2, 1>, scalar_prefetch = 0 : i64, scratch_operands = 2 : i64, tpu.core_type = #tpu.core_type<tc>, window_params = [{transform_indices = @transform_0, window_bounds = array<i64: 1, 4, 256>}, {transform_indices = @transform_1, window_bounds = array<i64: 1, 1, 256>}, {transform_indices = @transform_2, window_bounds = array<i64: 1, 1, 1>}, {transform_indices = @transform_3, window_bounds = array<i64: 1, 1, 1>}]} {
    %c0_i32 = arith.constant 0 : i32
    %0 = arith.cmpi eq, %arg1, %c0_i32 : i32
    %1 = arith.extui %0 : i1 to i32
    %c0_i32_0 = arith.constant 0 : i32
    %2 = arith.cmpi ne, %1, %c0_i32_0 : i32
    scf.if %2 {
      %cst_20 = arith.constant 0.000000e+00 : f32
      %34 = vector.broadcast %cst_20 : f32 to vector<1x256xf32>
      %c0_21 = arith.constant 0 : index
      %c0_22 = arith.constant 0 : index
      %35 = vector.load %arg6[%c0_21, %c0_22] : memref<1x256xf32, #tpu.memory_space<vmem>>, vector<1x256xf32>
      tpu.vector_store %arg6[%c0_21, %c0_22], %34 {strides = array<i32>} : memref<1x256xf32, #tpu.memory_space<vmem>>, vector<1x256xf32>,
      %cst_23 = arith.constant 0.000000e+00 : f32
      %36 = vector.broadcast %cst_23 : f32 to vector<1x256xf32>
      %c0_24 = arith.constant 0 : index
      %c0_25 = arith.constant 0 : index
      %37 = vector.load %arg7[%c0_24, %c0_25] : memref<1x256xf32, #tpu.memory_space<vmem>>, vector<1x256xf32>
      tpu.vector_store %arg7[%c0_24, %c0_25], %36 {strides = array<i32>} : memref<1x256xf32, #tpu.memory_space<vmem>>, vector<1x256xf32>,
    } else {
    }
    %c0 = arith.constant 0 : index
    %c0_1 = arith.constant 0 : index
    %c0_2 = arith.constant 0 : index
    %3 = vector.load %arg2[%c0, %c0_1, %c0_2] : memref<1x4x256xf32, #tpu.memory_space<vmem>>, vector<1x4x256xf32>
    %4 = vector.shape_cast %3 : vector<1x4x256xf32> to vector<4x256xf32>
    %c0_3 = arith.constant 0 : index
    %c0_4 = arith.constant 0 : index
    %c0_5 = arith.constant 0 : index
    %5 = vector.load %arg3[%c0_3, %c0_4, %c0_5] : memref<1x1x256xi32, #tpu.memory_space<vmem>>, vector<1x1x256xi32>
    %6 = vector.shape_cast %5 : vector<1x1x256xi32> to vector<1x256xi32>
    %cst = arith.constant dense<0xFF800000> : vector<256xf32>
    %7 = vector.multi_reduction <maximumf>, %4, %cst [0] : vector<4x256xf32> to vector<256xf32>
    %8 = vector.shape_cast %7 : vector<256xf32> to vector<1x256xf32>
    %9 = vector.broadcast %8 : vector<1x256xf32> to vector<4x256xf32>
    %10 = arith.subf %4, %9 : vector<4x256xf32>
    %11 = math.exp %10 : vector<4x256xf32>
    %cst_6 = arith.constant dense<0.000000e+00> : vector<256xf32>
    %12 = vector.multi_reduction <add>, %11, %cst_6 [0] : vector<4x256xf32> to vector<256xf32>
    %13 = vector.shape_cast %12 : vector<256xf32> to vector<1x256xf32>
    %14 = math.log %13 : vector<1x256xf32>
    %15 = arith.addf %14, %8 : vector<1x256xf32>
    %16 = tpu.iota {dimensions = array<i32: 0>} : vector<4x256xi32>
    %17 = vector.broadcast %6 : vector<1x256xi32> to vector<4x256xi32>
    %18 = arith.cmpi eq, %16, %17 : vector<4x256xi32>
    %cst_7 = arith.constant 0.000000e+00 : f32
    %19 = vector.broadcast %cst_7 : f32 to vector<4x256xf32>
    %20 = arith.select %18, %4, %19 : vector<4x256xi1>, vector<4x256xf32>
    %cst_8 = arith.constant dense<0.000000e+00> : vector<256xf32>
    %21 = vector.multi_reduction <add>, %20, %cst_8 [0] : vector<4x256xf32> to vector<256xf32>
    %22 = vector.shape_cast %21 : vector<256xf32> to vector<1x256xf32>
    %23 = arith.subf %15, %22 : vector<1x256xf32>
    %c0_9 = arith.constant 0 : index
    %c0_10 = arith.constant 0 : index
    %24 = vector.load %arg6[%c0_9, %c0_10] : memref<1x256xf32, #tpu.memory_space<vmem>>, vector<1x256xf32>
    %25 = arith.addf %24, %23 : vector<1x256xf32>
    %c0_11 = arith.constant 0 : index
    %c0_12 = arith.constant 0 : index
    %26 = vector.load %arg6[%c0_11, %c0_12] : memref<1x256xf32, #tpu.memory_space<vmem>>, vector<1x256xf32>
    tpu.vector_store %arg6[%c0_11, %c0_12], %25 {strides = array<i32>} : memref<1x256xf32, #tpu.memory_space<vmem>>, vector<1x256xf32>,
    %c0_13 = arith.constant 0 : index
    %c0_14 = arith.constant 0 : index
    %27 = vector.load %arg7[%c0_13, %c0_14] : memref<1x256xf32, #tpu.memory_space<vmem>>, vector<1x256xf32>
    %cst_15 = arith.constant 1.000000e+00 : f32
    %28 = vector.broadcast %cst_15 : f32 to vector<1x256xf32>
    %29 = arith.addf %27, %28 : vector<1x256xf32>
    %c0_16 = arith.constant 0 : index
    %c0_17 = arith.constant 0 : index
    %30 = vector.load %arg7[%c0_16, %c0_17] : memref<1x256xf32, #tpu.memory_space<vmem>>, vector<1x256xf32>
    tpu.vector_store %arg7[%c0_16, %c0_17], %29 {strides = array<i32>} : memref<1x256xf32, #tpu.memory_space<vmem>>, vector<1x256xf32>,
    %c0_i32_18 = arith.constant 0 : i32
    %31 = arith.cmpi eq, %arg1, %c0_i32_18 : i32
    %32 = arith.extui %31 : i1 to i32
    %c0_i32_19 = arith.constant 0 : i32
    %33 = arith.cmpi ne, %32, %c0_i32_19 : i32
    scf.if %33 {
      %c0_20 = arith.constant 0 : index
      %c0_21 = arith.constant 0 : index
      %34 = vector.load %arg6[%c0_20, %c0_21] : memref<1x256xf32, #tpu.memory_space<vmem>>, vector<1x256xf32>
      %35 = vector.shape_cast %34 : vector<1x256xf32> to vector<1x1x256xf32>
      %cst_22 = arith.constant dense<0.000000e+00> : vector<1xf32>
      %36 = vector.multi_reduction <add>, %35, %cst_22 [1, 2] : vector<1x1x256xf32> to vector<1xf32>
      %37 = vector.shape_cast %36 : vector<1xf32> to vector<1x1x1xf32>
      %38 = vector.extract %37[0, 0, 0] : f32 from vector<1x1x1xf32>
      %39 = vector.broadcast %38 : f32 to vector<1x1xf32>
      %c0_23 = arith.constant 0 : index
      %c0_24 = arith.constant 0 : index
      %c0_25 = arith.constant 0 : index
      %40 = vector.load %arg4[%c0_23, %c0_24, %c0_25] : memref<1x1x1xf32, #tpu.memory_space<vmem>>, vector<1x1x1xf32>
      %41 = vector.shape_cast %40 : vector<1x1x1xf32> to vector<1x1xf32>
      %42 = vector.shape_cast %39 : vector<1x1xf32> to vector<1x1x1xf32>
      tpu.vector_store %arg4[%c0_23, %c0_24, %c0_25], %42 {strides = array<i32>} : memref<1x1x1xf32, #tpu.memory_space<vmem>>, vector<1x1x1xf32>,
      %c0_26 = arith.constant 0 : index
      %c0_27 = arith.constant 0 : index
      %43 = vector.load %arg7[%c0_26, %c0_27] : memref<1x256xf32, #tpu.memory_space<vmem>>, vector<1x256xf32>
      %44 = vector.shape_cast %43 : vector<1x256xf32> to vector<1x1x256xf32>
      %cst_28 = arith.constant dense<0.000000e+00> : vector<1xf32>
      %45 = vector.multi_reduction <add>, %44, %cst_28 [1, 2] : vector<1x1x256xf32> to vector<1xf32>
      %46 = vector.shape_cast %45 : vector<1xf32> to vector<1x1x1xf32>
      %47 = vector.extract %46[0, 0, 0] : f32 from vector<1x1x1xf32>
      %48 = vector.broadcast %47 : f32 to vector<1x1xf32>
      %c0_29 = arith.constant 0 : index
      %c0_30 = arith.constant 0 : index
      %c0_31 = arith.constant 0 : index
      %49 = vector.load %arg5[%c0_29, %c0_30, %c0_31] : memref<1x1x1xf32, #tpu.memory_space<vmem>>, vector<1x1x1xf32>
      %50 = vector.shape_cast %49 : vector<1x1x1xf32> to vector<1x1xf32>
      %51 = vector.shape_cast %48 : vector<1x1xf32> to vector<1x1x1xf32>
      tpu.vector_store %arg5[%c0_29, %c0_30, %c0_31], %51 {strides = array<i32>} : memref<1x1x1xf32, #tpu.memory_space<vmem>>, vector<1x1x1xf32>,
    } else {
    }
    return
  }
  func.func @transform_0(%arg0: i32, %arg1: i32) -> (i32, i32, i32) {
    %c0_i32 = arith.constant 0 : i32
    %c0_i32_0 = arith.constant 0 : i32
    return %arg0, %c0_i32, %arg1 : i32, i32, i32
  }
  func.func @transform_1(%arg0: i32, %arg1: i32) -> (i32, i32, i32) {
    %c0_i32 = arith.constant 0 : i32
    %c0_i32_0 = arith.constant 0 : i32
    return %arg0, %c0_i32, %arg1 : i32, i32, i32
  }
  func.func @transform_2(%arg0: i32, %arg1: i32) -> (i32, i32, i32) {
    %c0_i32 = arith.constant 0 : i32
    %c0_i32_0 = arith.constant 0 : i32
    %c0_i32_1 = arith.constant 0 : i32
    return %arg0, %c0_i32, %c0_i32_0 : i32, i32, i32
  }
  func.func @transform_3(%arg0: i32, %arg1: i32) -> (i32, i32, i32) {
    %c0_i32 = arith.constant 0 : i32
    %c0_i32_0 = arith.constant 0 : i32
    %c0_i32_1 = arith.constant 0 : i32
    return %arg0, %c0_i32, %c0_i32_0 : i32, i32, i32
  }
}

</mosaic_0001>

<bundles_post_ra>
// kernel: tpu_custom_call.1
= control target key start
LH: loop header
LB: loop body
LE: loop exit
PB: predicated region body
PF: predicated region fallthrough
CT: control target
= control target key end

     0   :  { %9 = vsyncpa [#allocation5], 0  ;;  %s980_s0 = inlined_call_operand.hbm [shape: f32[2,4,256], index: 0, kind: input, shape index: {}]   ;;  %s981_s1 = inlined_call_operand.hbm [shape: s32[2,1,256], index: 1, kind: input, shape index: {}]   ;;  %s982_s2 = inlined_call_operand.vmem [shape: f32[2,1,1], index: 2, kind: output, shape index: {0}]   ;;  %s983_s3 = inlined_call_operand.vmem [shape: f32[2,1,1], index: 3, kind: output, shape index: {1}]  }
   0x1   :  { %11 = vsyncpa [#allocation5 + $0x1], 0 }
   0x2   :  { %12 = vsyncpa [#allocation7], 0 }
   0x3   :  { %14 = vsyncpa [#allocation7 + $0x1], 0  ;;  %s780_s12 = smov 0   ;;  %s782_s13 = smov 0  }
   0x4   :  { %s784_s14 = smov 0   ;;  %s786_s15 = smov 0  }
   0x5   :  { %s788_s16 = smov 0   ;;  %s790_s17 = smov 0  }
   0x6 LB: > { %s550_s18 = sadd.s32 4294967295, %s754_s17   ;;  %s32_s19 = sadd.s32 1, %s750_s16  ;;  %s754_s17 = sphi %s790_s17, %s20_s17   ;;  %s750_s16 = sphi %s788_s16, %s999_s16   ;;  %s746_s15 = sphi %s786_s15, %s998_s15   ;;  %s742_s14 = sphi %s784_s14, %s997_s14   ;;  %s738_s13 = sphi %s782_s13, %s996_s13   ;;  %s734_s12 = sphi %s780_s12, %s995_s12  }
   0x7   : > { %p34_p0 = scmp.ge.s32.totalorder %s32_s19, 2  ;;  %s41_s20 = sadd.s32 1, %s742_s14 }
   0x8   : > { %p48_p1 = scmp.ne.s32.totalorder %s742_s14, %s738_s13  ;;  %p49_p2 = scmp.eq.s32.totalorder %s754_s17, 0 }
   0x9   : > { %s1001_s19 = smov (%p34_p0, %s32_s19), 0  ;;  %p54_p4 = scmp.ne.s32.totalorder %s738_s13, %s734_s12 }
   0xa   : > { %p816_p3 = por %p49_p2, %p48_p1  ;;  %s36_s22 = ssub.s32 %s750_s16, %s1001_s19 }
   0xb   : > { %p55_p5 = scmp.eq.s32.totalorder %s550_s18, 0  ;;  %p39_p6 = scmp.eq.s32.totalorder %s36_s22, 0 }
   0xc   : > { %p582_p8 = scmp.lt.s32.totalorder %s754_s17, 2  ;;  %s832_s25 = sand.u32 1, %s742_s14  }
   0xd   : > { %p823_p7 = por %p55_p5, %p54_p4  ;;  %s565_s26 = sshll.u32 %s750_s16, 7 }
   0xe   : > { %s829_s24 = scalar_select %p39_p6, %s742_s14, %s41_s20  }
   0xf   : > { %s986_s23 = scalar_select %p823_p7, 1, 0 }
  0x10   : > { %s554_s27 = sshll.u32 %s832_s25, 3  ;;  %s839_s30 = scalar_lea.hbm %s980_s0, %s565_s26 }
  0x11   : > { %s162_s4 = scalar_lea.vmem [#allocation4], %s554_s27  ;;  %p843_p9 = pnand %p582_p8, %p816_p3 }
  0x12   : > { %s172_s5 = sshll.u32 %s162_s4, 4  ;;  %s159_s7 = scalar_lea.sflag [#allocation5], %s832_s25  ;;  %s847_s5 = int_to_ptr.vmem [resolvable:$true] %s172_s5 }
  0x13   : > { %s640_s8 = scalar_lea.hbm %s839_s30, 128  ;;  %p642_p13 = pneg %p843_p9 }
  0x14   : > { %p641_p12 = scmp.ne.s32.totalorder %s839_s30, %s640_s8  ;;  %s645_s11 = scalar_lea.hbm %s980_s0, 256 }
  0x15   : > { %p646_p2 = scmp.lt.u32.totalorder %s839_s30, %s980_s0  ;;  %p647_p3 = scmp.lt.u32.totalorder %s645_s11, %s640_s8 }
  0x16   : > { %p643_p0 = pnand %p642_p13, %p641_p12  ;;  %p649_p5 = scmp.lt.u32.totalorder %s640_s8, %s839_s30 }
  0x17   : > { %p648_p4 = por %p647_p3, %p646_p2 }
  0x18   : > { %p644_p1 = pneg %p643_p0 }
  0x19   : > { %p650_p6 = por %p649_p5, %p648_p4 }
  0x1b   : > { %p651_p8 = pnand %p650_p6, %p644_p1 }
  0x1d   : > { %654 = shalt.err (!%p651_p8)
}
  0x1e   : > { %s655_s20 = scalar_lea.vmem %s847_s5, 128  ;;  %s756_s21 = smov [#allocation4]  }
  0x1f   : > { %p656_p12 = scmp.ne.s32.totalorder %s847_s5, %s655_s20  ;;  %s660_s22 = sshll.u32 %s756_s21, 4  ;;  %s661_s22 = int_to_ptr.vmem [resolvable:$false] %s660_s22 }
  0x20   : > { %s662_s26 = scalar_lea.vmem %s661_s22, 256  ;;  %p663_p11 = scmp.lt.s32.totalorder %s847_s5, %s661_s22 }
  0x21   : > { %p658_p0 = pnand %p656_p12, %p642_p13  ;;  %p664_p2 = scmp.lt.s32.totalorder %s662_s26, %s655_s20 }
  0x23   : > { %p659_p10 = pneg %p658_p0  ;;  %p665_p3 = por %p664_p2, %p663_p11 }
  0x25   : > { %p666_p4 = pnand %p665_p3, %p659_p10 }
  0x27   : > { %669 = shalt.err (!%p666_p4)
}
  0x28   : > { %578 = dma.hbm_to_vmem [thread:$0]  (!%p843_p9), %s839_s30, 128, %s847_s5, %s159_s7  }
  0x29   : > { %p988_p1 = scmp.lt.s32.totalorder %s754_s17, 3  ;;  %p989_p5 = scmp.ge.s32.totalorder %s754_s17, 1 }
  0x2a   : > { %s557_s28 = sshll.u32 %s832_s25, 1  ;;  %s566_s29 = sshll.u32 %s750_s16, 5 }
  0x2b   : > { %p881_p6 = pnand %p989_p5, %p988_p1  ;;  %s890_s9 = scalar_lea.hbm %s981_s1, %s566_s29 }
  0x2c   : > { %s183_s10 = scalar_lea.vmem [#allocation6], %s557_s28  ;;  %s180_s30 = scalar_lea.sflag [#allocation7], %s832_s25 }
  0x2d   : > { %s990_s27 = scalar_select %p881_p6, 1, 0 }
  0x2e   : > { %s193_s11 = sshll.u32 %s183_s10, 4  ;;  %s670_s5 = scalar_lea.hbm %s890_s9, 32  ;;  %s194_s11 = int_to_ptr.vmem [resolvable:$true] %s193_s11 }
  0x2f   : > { %p671_p10 = scmp.ne.s32.totalorder %s890_s9, %s670_s5  ;;  %s675_s18 = scalar_lea.hbm %s981_s1, 64 }
  0x30   : > { %p676_p12 = scmp.lt.u32.totalorder %s890_s9, %s981_s1  ;;  %p677_p0 = scmp.lt.u32.totalorder %s675_s18, %s670_s5 }
  0x31   : > { %p673_p11 = pnand %p671_p10, %p642_p13  ;;  %p679_p3 = scmp.lt.u32.totalorder %s670_s5, %s890_s9 }
  0x32   : > { %p678_p2 = por %p677_p0, %p676_p12 }
  0x33   : > { %p674_p8 = pneg %p673_p11 }
  0x34   : > { %p680_p4 = por %p679_p3, %p678_p2 }
  0x36   : > { %p681_p1 = pnand %p680_p4, %p674_p8 }
  0x38   : > { %684 = shalt.err (!%p681_p1)
}
  0x39   : > { %s685_s25 = scalar_lea.vmem %s194_s11, 32  ;;  %s757_s22 = smov [#allocation6]  }
  0x3a   : > { %p686_p5 = scmp.ne.s32.totalorder %s194_s11, %s685_s25  ;;  %s690_s26 = sshll.u32 %s757_s22, 4  ;;  %s691_s26 = int_to_ptr.vmem [resolvable:$false] %s690_s26 }
  0x3b   : > { %s692_s28 = scalar_lea.vmem %s691_s26, 64  ;;  %p693_p7 = scmp.lt.s32.totalorder %s194_s11, %s691_s26 }
  0x3c   : > { %p688_p10 = pnand %p686_p5, %p642_p13  ;;  %p694_p6 = scmp.lt.s32.totalorder %s692_s28, %s685_s25 }
  0x3e   : > { %p689_p11 = pneg %p688_p10  ;;  %p695_p0 = por %p694_p6, %p693_p7 }
  0x40   : > { %p696_p12 = pnand %p695_p0, %p689_p11 }
  0x42   : > { %699 = shalt.err (!%p696_p12)
}
  0x43   : > { %581 = dma.hbm_to_vmem [thread:$0]  (!%p843_p9), %s890_s9, 32, %s194_s11, %s180_s30  }
  0x44   : > { %p991_p8 = scmp.ne.s32.totalorder %s990_s27, 0 }
  0x45   : > { %s204_s29 = sand.u32 (!%p991_p8), 1, %s738_s13   ;;  %p992_p13 = scmp.ne.s32.totalorder (!%p991_p8), %s986_s23, 0 }
  0x46   : > { %202 = sbr.rel (%p991_p8) target bundleno = 377 (0x179), region = 28  ;;  %s561_s4 = sshll.u32 (!%p991_p8), %s204_s29, 3 }
  0x47   : > { %s205_s8 = scalar_lea.sflag (!%p991_p8), [#allocation5], %s204_s29  ;;  %s208_s10 = scalar_lea.vmem (!%p991_p8), [#allocation4], %s561_s4 }
  0x4d   : > { %725 = dma.done.wait (%p992_p13), %s205_s8, 128  }
  0x4e   : > { %727 = vsyncadd (%p992_p13), %s205_s8, 4294967168  ;;  %s562_s5 = sshll.u32 %s204_s29, 1  ;;  %s214_s7 = scalar_lea.sflag [#allocation7], %s204_s29 }
  0x4f   : > { %s919_s6 = scalar_lea.vmem [#allocation6], %s562_s5 }
  0x50   : > { %729 = dma.done.wait (%p992_p13), %s214_s7, 32  }
  0x51   : > { %731 = vsyncadd (%p992_p13), %s214_s7, 4294967264  ;;  %v258_v0 = vlaneseq  ;;  %v758_v2 = vmov 0.0   ;;  %vm269_vm1 = vcmask 1043456   ;;  %v264_v3 = vld [vmem:[%s208_s10] sm:$0xff]  ;;  %v265_v26 = vld [vmem:[%s919_s6] sm:$0x3] }
  0x52   : > { %v267_v4 = vcombine.high %v264_v3, %v264_v3  ;;  %v270_v5 = vsel %vm269_vm1, %v264_v3, -inf  ;;  %v759_v60 = vmov 1966171168   ;;  %vm387_vm4 = vcmask 1040384   ;;  %p248_p7 = scmp.lt.s32.totalorder %s746_s15, 1 }
  0x53   : > { %vm925_vm0 = vcmp.lt.s32.totalorder %v258_v0, 256  ;;  %v271_v6 = vrot.slane %v270_v5, 4  ;;  %v315_v22 = vshrl.u32 %v258_v0, 7  ;;  %v349_v61 = vunpack.c.l.s4 %v759_v60 }
  0x54   : > { %262 = vst.msk [vmem:[#allocation2] sm:$0x3] %vm925_vm0, %v758_v2  ;;  %263 = vst.msk [vmem:[#allocation3] sm:$0x3] %vm925_vm0, %v758_v2  ;;  %v277_v7 = vsel %vm269_vm1, %v267_v4, -inf  ;;  %s1003_s15 = smov (!%p248_p7, %s746_s15), 1 }
  0x55   : > { %v272_v9 = vmax.f32 %v270_v5, %v271_v6  ;;  %v278_v10 = vrot.slane %v277_v7, 4  ;;  %v937_v25 = vsub.s32 0, %v315_v22  ;;  %v940_v27 = vsub.s32 1, %v315_v22  ;;  %s250_s9 = scalar_lea.vmem %s982_s2, %s1003_s15  ;;  %s253_s18 = scalar_lea.vmem %s983_s3, %s1003_s15 }
  0x56   : > { %v350_v6 = vunpack.c.0.s8 %v349_v61  ;;  %vm401_vm5 = vcmask 0  }
  0x57   : > { %v273_v12 = vrot.slane %v272_v9, 2  ;;  %v279_v13 = vmax.f32 %v277_v7, %v278_v10  ;;  %v319_v28 = vrot.slane %v265_v26, %v937_v25  ;;  %v323_v29 = vrot.slane %v265_v26, %v940_v27 }
  0x58   : > { %v353_v10 = vsub.s32 %v350_v6, %v315_v22 }
  0x59   : > { %v274_v14 = vmax.f32 %v272_v9, %v273_v12  ;;  %v280_v15 = vrot.slane %v279_v13, 2  ;;  %vm324_vm2 = vcmp.eq.s32.totalorder %v315_v22, %v319_v28  ;;  %vm325_vm3 = vcmp.eq.s32.totalorder %v315_v22, %v323_v29 }
  0x5a   : > { %v326_v30 = vsel %vm324_vm2, %v264_v3, 0.0  ;;  %v327_v34 = vsel %vm325_vm3, %v267_v4, 0.0 }
  0x5b   : > { %v369_v8 = vld [vmem:[#allocation3] sm:$0x3]  ;;  %v275_v16 = vrot.slane %v274_v14, 1  ;;  %v281_v17 = vmax.f32 %v279_v13, %v280_v15  ;;  %v328_v36 = vsel %vm269_vm1, %v326_v30, 0.0  ;;  %v335_v40 = vsel %vm269_vm1, %v327_v34, 0.0 }
  0x5c   : > { %v370_v11 = vadd.f32 1.0, %v369_v8  ;;  %v329_v41 = vrot.slane %v328_v36, 4  ;;  %v336_v44 = vrot.slane %v335_v40, 4  ;;  %v344_v13 = vld [vmem:[#allocation2] sm:$0x3] }
  0x5d   : > { %v276_v18 = vmax.f32 %v274_v14, %v275_v16  ;;  %v282_v19 = vrot.slane %v281_v17, 1 }
  0x5e   : > { %371 = vst.msk [vmem:[#allocation3] sm:$0x3] %vm925_vm0, %v370_v11  ;;  %v330_v47 = vadd.f32 %v329_v41, %v328_v36  ;;  %v337_v50 = vadd.f32 %v336_v44, %v335_v40 }
  0x5f   : > { %v283_v20 = vmax.f32 %v281_v17, %v282_v19 }
  0x60   : > { %v331_v53 = vrot.slane %v330_v47, 2  ;;  %v338_v55 = vrot.slane %v337_v50, 2 }
  0x61   : > { %v286_v21 = vcombine.low %v276_v18, %v283_v20 }
  0x62   : > { %v332_v56 = vadd.f32 %v331_v53, %v330_v47  ;;  %v339_v57 = vadd.f32 %v338_v55, %v337_v50 }
  0x63   : > { %v288_v23 = vsub.f32 %v264_v3, %v286_v21 }
  0x64   : > { %v333_v58 = vrot.slane %v332_v56, 1  ;;  %v340_v59 = vrot.slane %v339_v57, 1 }
  0x65   : > { %v289_v24 = vmul.f32 1.442695, %v288_v23  ;;  %v403_v16 = vld [vmem:[#allocation3] sm:$0x3] }
  0x66   : > { %v334_v0 = vadd.f32 %v333_v58, %v332_v56  ;;  %v341_v5 = vadd.f32 %v340_v59, %v339_v57  ;;  %v408_v17 = vrot.slane %v403_v16, %v937_v25  ;;  %v412_v19 = vrot.slane %v403_v16, %v940_v27 }
  0x67   : > { %634 = vpow2.f32 %v289_v24 }
  0x68   : > { %v415_v24 = vsel %vm387_vm4, %v408_v17, 0.0  ;;  %v416_v26 = vsel %vm387_vm4, %v412_v19, 0.0 }
  0x69   : > { %v417_v29 = vadd.f32 %v416_v26, %v415_v24 }
  0x71   : > { %v635_v31 = vpop.eup %634 }
  0x72   : > { %v292_v32 = vcombine.high %v635_v31, %v635_v31  ;;  %v294_v33 = vsel %vm269_vm1, %v635_v31, 0.0 }
  0x73   : > { %v295_v35 = vrot.slane %v294_v33, 4 }
  0x74   : > { %v301_v37 = vsel %vm269_vm1, %v292_v32, 0.0 }
  0x75   : > { %v296_v38 = vadd.f32 %v295_v35, %v294_v33  ;;  %v302_v39 = vrot.slane %v301_v37, 4 }
  0x77   : > { %v297_v42 = vrot.slane %v296_v38, 2  ;;  %v303_v43 = vadd.f32 %v302_v39, %v301_v37 }
  0x79   : > { %v298_v45 = vadd.f32 %v297_v42, %v296_v38  ;;  %v304_v46 = vrot.slane %v303_v43, 2 }
  0x7b   : > { %v299_v48 = vrot.slane %v298_v45, 1  ;;  %v305_v49 = vadd.f32 %v304_v46, %v303_v43 }
  0x7d   : > { %v300_v51 = vadd.f32 %v299_v48, %v298_v45  ;;  %v306_v52 = vrot.slane %v305_v49, 1 }
  0x7f   : > { %v307_v54 = vadd.f32 %v306_v52, %v305_v49  ;;  %636 = vlog2.f32 %v300_v51 }
  0x81   : > { %638 = vlog2.f32 %v307_v54 }
  0x89   : > { %v637_v62 = vpop.eup %636 }
  0x8a   : > { %v309_v63 = vmul.f32 0.6931472, %v637_v62 }
  0x8b   : > { %v639_v2 = vpop.eup %638 }
  0x8c   : > { %v311_v3 = vmul.f32 0.6931472, %v639_v2  ;;  %v312_v4 = vadd.f32 %v309_v63, %v276_v18 }
  0x8e   : > { %v313_v7 = vadd.f32 %v311_v3, %v283_v20  ;;  %v342_v8 = vsub.f32 %v312_v4, %v334_v0 }
  0x90   : > { %v343_v9 = vsub.f32 %v313_v7, %v341_v5 }
  0x92   : > { %v347_v11 = vcombine.low %v342_v8, %v343_v9 }
  0x94   : > { %v354_v12 = vrot.slane %v347_v11, %v353_v10 }
  0x96   : > { %v361_v14 = vrot.slane %v354_v12, %v353_v10 }
  0x98   : > { %v363_v15 = vadd.f32 %v361_v14, %v344_v13 }
  0x9a   : > { %368 = vst.msk [vmem:[#allocation2] sm:$0x3] %vm925_vm0, %v363_v15 }
  0xa1   : > { %v375_v18 = vld [vmem:[#allocation2] sm:$0x3] }
  0xa2   : > { %v380_v20 = vrot.slane %v375_v18, %v937_v25  ;;  %v384_v21 = vrot.slane %v375_v18, %v940_v27 }
  0xa4   : > { %v388_v22 = vsel %vm387_vm4, %v380_v20, 0.0  ;;  %v389_v23 = vsel %vm387_vm4, %v384_v21, 0.0 }
  0xa5   : > { %v390_v28 = vadd.f32 %v389_v23, %v388_v22 }
  0xa7   : > { %391 = vadd.xlane.f32.xlu0 %v390_v28 }
  0xab   : > { %418 = vadd.xlane.f32.xlu0 %v417_v29 }
 0x134   : > { %v392_v1 = vpop.xlane.xlu0 %391 }
 0x135   : > { %v393_v30 = vrot.slane %v392_v1, 4 }
 0x137   : > { %v394_v31 = vadd.f32 %v393_v30, %v392_v1 }
 0x138   : > { %v419_v32 = vpop.xlane.xlu0 %418 }
 0x139   : > { %v395_v33 = vrot.slane %v394_v31, 2  ;;  %v420_v34 = vrot.slane %v419_v32, 4 }
 0x13b   : > { %v421_v35 = vadd.f32 %v420_v34, %v419_v32  ;;  %v396_v25 = vadd.f32 %v395_v33, %v394_v31 }
 0x13d   : > { %v422_v36 = vrot.slane %v421_v35, 2  ;;  %v397_v27 = vrot.slane %v396_v25, 1 }
 0x13f   : > { %v423_v37 = vadd.f32 %v422_v36, %v421_v35  ;;  %v398_v38 = vadd.f32 %v397_v27, %v396_v25 }
 0x141   : > { %567 = vpush %v398_v38  ;;  %v424_v39 = vrot.slane %v423_v37, 1 }
 0x143   : > { %v425_v40 = vadd.f32 %v424_v39, %v423_v37 }
 0x145   : > { %569 = vpush %v425_v40 }
 0x172   : > { %s568_s11 = spop %567 }
 0x173   : > { %v400_v41 = vstv %s568_s11 }
 0x174   : > { %402 = vst.msk [vmem:[%s250_s9] sm:$0x1] %vm401_vm5, %v400_v41 }
 0x176   : > { %s570_s20 = spop %569 }
 0x177   : > { %v427_v42 = vstv %s570_s20 }
 0x178   : > { %428 = vst.msk [vmem:[%s253_s18] sm:$0x1] %vm401_vm5, %v427_v42 }
 0x179 PF: > { %s20_s17 = sadd.s32 1, %s754_s17   ;;  %s995_s12 = smov %s738_s13 }
 0x17a   : > { %p17_p9 = scmp.ge.s32.totalorder %s20_s17, 4   ;;  %s996_s13 = smov %s742_s14 }
 0x17b   : > { %s997_s14 = smov %s829_s24  ;;  %s998_s15 = smov %s750_s16 }
 0x17c   : > { %s999_s16 = smov %s1001_s19  ;;  %19 = sbr.rel (!%p17_p9) target bundleno = 6 (0x6), region = 101 }
 0x183   :  { %458 = vsyncpa [#allocation5], 1 }
 0x184   :  { %460 = vsyncpa [#allocation5 + $0x1], 1 }
 0x185   :  { %461 = vsyncpa [#allocation7], 1 }
 0x186   :  { %463 = vsyncpa [#allocation7 + $0x1], 1 }

</bundles_post_ra>
